<compile_context>
chip_gen: v7x
topology: tpu7x:2x2x1
jax: 0.10.0
libtpu: 0.0.40
codegen_flags: <defaults>
</compile_context>

<pallas_src>
import functools

import jax
import jax.numpy as jnp
from jax.experimental import pallas as pl
from jax.experimental.pallas import tpu as pltpu


def _weight_norm(v, g):
    """PyTorch weight_norm with default dim=0: per-output-channel normalization."""
    norm = jnp.sqrt(jnp.sum(v * v, axis=(1, 2), keepdims=True))
    return g * v / norm


def residual_block_kernel(x_ref, w_dil_ref, b_dil_ref, w1x1_ref, b1x1_ref,
                          res_ref, skip_ref, xbuf_ref, slab_ref, *,
                          kernel_size, dilation, pad, pad_al, time_tile,
                          channels, fuse_taps):
    """One (batch, time-tile) step.

    xbuf_ref : (pad_al + TL, C) f32 persistent scratch.  Rows [pad_al-pad, pad_al)
               hold the causal history (last `pad` rows of the previous tile, or
               zeros for the first tile of a sequence); rows [pad_al, pad_al+TL)
               hold the current tile.  pad_al is `pad` rounded up to 8 sublanes
               so the bulk store of the current tile is sublane-aligned.
    slab_ref : (TL, K*C) compute-dtype scratch for the fused im2col matmul
               (dummy (8,128) when the per-tap path is used).
    """
    t = pl.program_id(1)
    TL, C = time_tile, channels

    if pad > 0:
        @pl.when(t == 0)
        def _zero_history():
            # Causal left padding for the first time tile of every sequence.
            xbuf_ref[0:pad_al, :] = jnp.zeros((pad_al, C), xbuf_ref.dtype)

    # Current tile (compute dtype in HBM -> f32 staging for the residual add).
    x_cur = x_ref[0].astype(jnp.float32)                     # (TL, C)
    xbuf_ref[pad_al:pad_al + TL, :] = x_cur

    base = pad_al - pad  # local row of global time index (tile_start - pad)

    if fuse_taps:
        # Pack the K shifted slices side-by-side -> one fat MXU contraction.
        for k in range(kernel_size):
            s = base + k * dilation
            slab_ref[:, k * C:(k + 1) * C] = (
                xbuf_ref[s:s + TL, :].astype(slab_ref.dtype))
        acc = jnp.dot(slab_ref[...], w_dil_ref[...],
                      preferred_element_type=jnp.float32)
        acc = acc + b_dil_ref[...]                           # (1, 2C) broadcast
    else:
        # Contraction dim already fills the MXU; skip the slab copy.
        acc = jnp.broadcast_to(b_dil_ref[...], (TL, 2 * C))  # bias-folded init
        for k in range(kernel_size):
            s = base + k * dilation
            acc = acc + jnp.dot(
                xbuf_ref[s:s + TL, :].astype(w_dil_ref.dtype),
                w_dil_ref[k * C:(k + 1) * C, :],
                preferred_element_type=jnp.float32)

    # torch.chunk(x, 2, dim=1): first C channels = filter, last C = gate.
    filt = acc[:, :C]
    gate = acc[:, C:]
    h = jnp.tanh(filt) * jax.nn.sigmoid(gate)                # f32 elementwise

    # 1x1 conv == matmul over channels; bias fused into the skip writeback.
    y = jnp.dot(h.astype(w1x1_ref.dtype), w1x1_ref[...],
                preferred_element_type=jnp.float32)
    skip = y + b1x1_ref[...]

    # TODO(synk): nn.Dropout is identity in eval mode; training-mode dropout not modeled.
    skip_ref[0] = skip.astype(skip_ref.dtype)
    res_ref[0] = (x_cur + skip).astype(res_ref.dtype)

    if pad > 0:
        # Carry the last `pad` rows of this tile as history for the next tile.
        xbuf_ref[pad_al - pad:pad_al, :] = xbuf_ref[pad_al + TL - pad:pad_al + TL, :]


def _pick_time_tile(L, pad):
    """Largest BlockSpec-legal divisor of L that is <= 512 and covers `pad`."""
    best = L
    for cand in range(min(L, 512), 0, -1):
        if L % cand == 0 and (cand % 8 == 0 or cand == L) and cand >= max(pad, 1):
            best = cand
            break
    return best


def residual_block_nlc(x_nlc, params, *, kernel_size, dilation,
                       compute_dtype=jnp.bfloat16, time_tile=None):
    """Core kernel in (N, L, C) layout. Returns (residual, skip), both f32 (N, L, C).

    A real WaveNet stack should call this directly and keep activations in
    (N, L, C) across all residual blocks (no per-block transpose round-trips).
    """
    N, L, C = x_nlc.shape
    pad = (kernel_size - 1) * dilation

    if time_tile is None:
        time_tile = _pick_time_tile(L, pad)   # bounded VMEM; fits v7x (64 MiB) too
    assert L % time_tile == 0, "time_tile must divide L"
    assert pad <= time_tile, "time tile must cover the causal receptive field"
    pad_al = ((pad + 7) // 8) * 8 if pad > 0 else 0
    num_t = L // time_tile

    # Effective (weight-normed) weights, reshaped for the (time, channel) layout.
    w_dil = _weight_norm(params["dil_v"], params["dil_g"])                 # (2C, C, K)
    w_dil_f = jnp.transpose(w_dil, (2, 1, 0)).reshape(kernel_size * C, 2 * C)
    b_dil = params["dil_b"].reshape(1, 2 * C).astype(jnp.float32)
    w1x1 = _weight_norm(params["p1_v"], params["p1_g"])[:, :, 0].T         # (C, C)
    b1x1 = params["p1_b"].reshape(1, C).astype(jnp.float32)

    # bf16 matmul operands (f32 accumulation inside the kernel); biases stay f32.
    x_c = x_nlc.astype(compute_dtype)
    w_dil_c = w_dil_f.astype(compute_dtype)
    w1x1_c = w1x1.astype(compute_dtype)

    # Fuse the K taps into one fat matmul only when C is small (otherwise the
    # MXU contraction dim is already full and the slab copy is wasted work).
    fuse = C < 128
    slab_shape = (time_tile, kernel_size * C) if fuse else (8, 128)

    kern = functools.partial(
        residual_block_kernel,
        kernel_size=kernel_size, dilation=dilation, pad=pad, pad_al=pad_al,
        time_tile=time_tile, channels=C, fuse_taps=fuse)

    itemsize = jnp.dtype(compute_dtype).itemsize
    cost = pl.CostEstimate(
        flops=2 * N * L * (kernel_size * C * 2 * C + C * C),
        transcendentals=2 * N * L * C,
        bytes_accessed=(N * L * C * itemsize            # x in
                        + 2 * N * L * C * 4             # res + skip out
                        + (w_dil_c.size + w1x1_c.size) * itemsize
                        + (b_dil.size + b1x1.size) * 4),
    )

    res, skip = pl.pallas_call(
        kern,
        out_shape=(jax.ShapeDtypeStruct((N, L, C), jnp.float32),
                   jax.ShapeDtypeStruct((N, L, C), jnp.float32)),
        grid_spec=pltpu.PrefetchScalarGridSpec(
            num_scalar_prefetch=0,
            grid=(N, num_t),
            in_specs=[
                pl.BlockSpec((1, time_tile, C), lambda b, t: (b, t, 0)),
                pl.BlockSpec((kernel_size * C, 2 * C), lambda b, t: (0, 0)),
                pl.BlockSpec((1, 2 * C), lambda b, t: (0, 0)),
                pl.BlockSpec((C, C), lambda b, t: (0, 0)),
                pl.BlockSpec((1, C), lambda b, t: (0, 0)),
            ],
            out_specs=[
                pl.BlockSpec((1, time_tile, C), lambda b, t: (b, t, 0)),
                pl.BlockSpec((1, time_tile, C), lambda b, t: (b, t, 0)),
            ],
            scratch_shapes=[
                pltpu.VMEM((pad_al + time_tile, C), jnp.float32),  # history + tile
                pltpu.VMEM(slab_shape, compute_dtype),             # im2col slab
            ],
        ),
        compiler_params=pltpu.CompilerParams(
            dimension_semantics=("parallel", "arbitrary"),
            vmem_limit_bytes=48 * 1024 * 1024,
        ),
        cost_estimate=cost,
    )(x_c, w_dil_c, b_dil, w1x1_c, b1x1)
    return res, skip


def residual_block(x_ncl, params, *, kernel_size, dilation,
                   compute_dtype=jnp.bfloat16, time_tile=None):
    """PyTorch-layout wrapper: x_ncl is (N, C, L); returns (residual, skip) in (N, C, L).

    Note: the transposes here exist only to match the PyTorch NCL interface for
    the test; a stacked model should stay in (N, L, C) and call residual_block_nlc.
    """
    x_nlc = jnp.transpose(x_ncl, (0, 2, 1))
    res, skip = residual_block_nlc(x_nlc, params, kernel_size=kernel_size,
                                   dilation=dilation, compute_dtype=compute_dtype,
                                   time_tile=time_tile)
    return jnp.transpose(res, (0, 2, 1)), jnp.transpose(skip, (0, 2, 1))


def reference_residual_block(x_ncl, params, *, kernel_size, dilation):
    """Pure-JAX reference using lax.conv_general_dilated for validation."""
    N, C, L = x_ncl.shape
    pad = (kernel_size - 1) * dilation
    w_dil = _weight_norm(params["dil_v"], params["dil_g"])      # (2C, C, K)
    b_dil = params["dil_b"]
    w1x1 = _weight_norm(params["p1_v"], params["p1_g"])         # (C, C, 1)
    b1x1 = params["p1_b"]

    y = jax.lax.conv_general_dilated(
        x_ncl, w_dil, window_strides=(1,), padding=((pad, 0),),
        rhs_dilation=(dilation,),
        dimension_numbers=("NCW", "OIW", "NCW"))
    y = y + b_dil[None, :, None]
    filt, gate = y[:, :C, :], y[:, C:, :]
    h = jnp.tanh(filt) * jax.nn.sigmoid(gate)
    s = jax.lax.conv_general_dilated(
        h, w1x1, window_strides=(1,), padding=((0, 0),),
        dimension_numbers=("NCW", "OIW", "NCW"))
    s = s + b1x1[None, :, None]
    return x_ncl + s, s


if __name__ == "__main__":
    # Small shapes consistent with the module: batch=2, channels=4, seq=16.
    N, C, L = 2, 4, 16
    kernel_size, dilation = 3, 2

    key = jax.random.PRNGKey(0)
    k_x, k_v, k_g, k_b, k_v1, k_g1, k_b1 = jax.random.split(key, 7)

    x = jax.random.normal(k_x, (N, C, L), dtype=jnp.float32)
    params = {
        "dil_v": jax.random.normal(k_v, (2 * C, C, kernel_size), jnp.float32) * 0.3,
        "dil_g": jax.random.normal(k_g, (2 * C, 1, 1), jnp.float32) * 0.5 + 1.0,
        "dil_b": jax.random.normal(k_b, (2 * C,), jnp.float32) * 0.1,
        "p1_v": jax.random.normal(k_v1, (C, C, 1), jnp.float32) * 0.3,
        "p1_g": jax.random.normal(k_g1, (C, 1, 1), jnp.float32) * 0.5 + 1.0,
        "p1_b": jax.random.normal(k_b1, (C,), jnp.float32) * 0.1,
    }

    res_ref, skip_ref = reference_residual_block(
        x, params, kernel_size=kernel_size, dilation=dilation)

    # 1) f32 compute path, single time tile: strict check against the conv reference.
    res32, skip32 = residual_block(x, params, kernel_size=kernel_size,
                                   dilation=dilation, compute_dtype=jnp.float32)
    jax.block_until_ready((res32, skip32))
    assert res32.shape == (N, C, L) and skip32.shape == (N, C, L)
    assert jnp.allclose(res32, res_ref, atol=1e-4, rtol=1e-4)
    assert jnp.allclose(skip32, skip_ref, atol=1e-4, rtol=1e-4)

    # 2) f32 compute path, two time tiles: exercises the cross-tile causal history carry.
    res_t, skip_t = residual_block(x, params, kernel_size=kernel_size,
                                   dilation=dilation, compute_dtype=jnp.float32,
                                   time_tile=8)
    jax.block_until_ready((res_t, skip_t))
    assert jnp.allclose(res_t, res_ref, atol=1e-4, rtol=1e-4)
    assert jnp.allclose(skip_t, skip_ref, atol=1e-4, rtol=1e-4)

    # 3) Default bf16 matmul-operand path: looser tolerance vs. the f32 reference.
    res16, skip16 = residual_block(x, params, kernel_size=kernel_size,
                                   dilation=dilation)
    jax.block_until_ready((res16, skip16))
    assert jnp.allclose(res16, res_ref, atol=5e-2, rtol=5e-2)
    assert jnp.allclose(skip16, skip_ref, atol=5e-2, rtol=5e-2)

    print("KERNEL_OK")
</pallas_src>

<mosaic_0001>
module attributes {stable_mosaic.version = 11 : i64} {
  func.func @residual_block_kernel(%arg0: i32, %arg1: i32, %arg2: memref<1x16x4xf32, #tpu.memory_space<vmem>>, %arg3: memref<12x8xf32, #tpu.memory_space<vmem>>, %arg4: memref<1x8xf32, #tpu.memory_space<vmem>>, %arg5: memref<4x4xf32, #tpu.memory_space<vmem>>, %arg6: memref<1x4xf32, #tpu.memory_space<vmem>>, %arg7: memref<1x16x4xf32, #tpu.memory_space<vmem>>, %arg8: memref<1x16x4xf32, #tpu.memory_space<vmem>>, %arg9: memref<24x4xf32, #tpu.memory_space<vmem>>, %arg10: memref<16x12xf32, #tpu.memory_space<vmem>>) attributes {dimension_semantics = [#tpu.dimension_semantics<parallel>, #tpu.dimension_semantics<arbitrary>], iteration_bounds = array<i64: 2, 1>, scalar_prefetch = 0 : i64, scratch_operands = 2 : i64, tpu.core_type = #tpu.core_type<tc>, window_params = [{transform_indices = @transform_0, window_bounds = array<i64: 1, 16, 4>}, {pipeline_mode = #tpu.pipeline_mode<synchronous>, transform_indices = @transform_1, window_bounds = array<i64: 12, 8>}, {pipeline_mode = #tpu.pipeline_mode<synchronous>, transform_indices = @transform_2, window_bounds = array<i64: 1, 8>}, {pipeline_mode = #tpu.pipeline_mode<synchronous>, transform_indices = @transform_3, window_bounds = array<i64: 4, 4>}, {pipeline_mode = #tpu.pipeline_mode<synchronous>, transform_indices = @transform_4, window_bounds = array<i64: 1, 4>}, {transform_indices = @transform_5, window_bounds = array<i64: 1, 16, 4>}, {transform_indices = @transform_6, window_bounds = array<i64: 1, 16, 4>}]} {
    %c0_i32 = arith.constant 0 : i32
    %0 = arith.cmpi eq, %arg1, %c0_i32 : i32
    %1 = arith.extui %0 : i1 to i32
    %c0_i32_0 = arith.constant 0 : i32
    %2 = arith.cmpi ne, %1, %c0_i32_0 : i32
    scf.if %2 {
      %cst_35 = arith.constant 0.000000e+00 : f32
      %41 = vector.broadcast %cst_35 : f32 to vector<8x4xf32>
      %c0_36 = arith.constant 0 : index
      %c0_37 = arith.constant 0 : index
      %42 = vector.load %arg9[%c0_36, %c0_37] : memref<24x4xf32, #tpu.memory_space<vmem>>, vector<8x4xf32>
      tpu.vector_store %arg9[%c0_36, %c0_37], %41 {strides = array<i32>} : memref<24x4xf32, #tpu.memory_space<vmem>>, vector<8x4xf32>,
    } else {
    }
    %c0 = arith.constant 0 : index
    %c0_1 = arith.constant 0 : index
    %c0_2 = arith.constant 0 : index
    %3 = vector.load %arg2[%c0, %c0_1, %c0_2] : memref<1x16x4xf32, #tpu.memory_space<vmem>>, vector<1x16x4xf32>
    %4 = vector.shape_cast %3 : vector<1x16x4xf32> to vector<16x4xf32>
    %c8 = arith.constant 8 : index
    %c0_3 = arith.constant 0 : index
    %5 = vector.load %arg9[%c8, %c0_3] : memref<24x4xf32, #tpu.memory_space<vmem>>, vector<16x4xf32>
    tpu.vector_store %arg9[%c8, %c0_3], %4 {strides = array<i32>} : memref<24x4xf32, #tpu.memory_space<vmem>>, vector<16x4xf32>,
    %c4 = arith.constant 4 : index
    %c0_4 = arith.constant 0 : index
    %6 = vector.load %arg9[%c4, %c0_4] : memref<24x4xf32, #tpu.memory_space<vmem>>, vector<16x4xf32>
    %c0_5 = arith.constant 0 : index
    %c0_6 = arith.constant 0 : index
    %7 = vector.load %arg10[%c0_5, %c0_6] : memref<16x12xf32, #tpu.memory_space<vmem>>, vector<16x4xf32>
    tpu.vector_store %arg10[%c0_5, %c0_6], %6 {strides = array<i32>} : memref<16x12xf32, #tpu.memory_space<vmem>>, vector<16x4xf32>,
    %c6 = arith.constant 6 : index
    %c0_7 = arith.constant 0 : index
    %8 = vector.load %arg9[%c6, %c0_7] : memref<24x4xf32, #tpu.memory_space<vmem>>, vector<16x4xf32>
    %c0_8 = arith.constant 0 : index
    %c4_9 = arith.constant 4 : index
    %9 = vector.load %arg10[%c0_8, %c4_9] : memref<16x12xf32, #tpu.memory_space<vmem>>, vector<16x4xf32>
    tpu.vector_store %arg10[%c0_8, %c4_9], %8 {strides = array<i32>} : memref<16x12xf32, #tpu.memory_space<vmem>>, vector<16x4xf32>,
    %c8_10 = arith.constant 8 : index
    %c0_11 = arith.constant 0 : index
    %10 = vector.load %arg9[%c8_10, %c0_11] : memref<24x4xf32, #tpu.memory_space<vmem>>, vector<16x4xf32>
    %c0_12 = arith.constant 0 : index
    %c8_13 = arith.constant 8 : index
    %11 = vector.load %arg10[%c0_12, %c8_13] : memref<16x12xf32, #tpu.memory_space<vmem>>, vector<16x4xf32>
    tpu.vector_store %arg10[%c0_12, %c8_13], %10 {strides = array<i32>} : memref<16x12xf32, #tpu.memory_space<vmem>>, vector<16x4xf32>,
    %c0_14 = arith.constant 0 : index
    %c0_15 = arith.constant 0 : index
    %12 = vector.load %arg10[%c0_14, %c0_15] : memref<16x12xf32, #tpu.memory_space<vmem>>, vector<16x12xf32>
    %c0_16 = arith.constant 0 : index
    %c0_17 = arith.constant 0 : index
    %13 = vector.load %arg3[%c0_16, %c0_17] : memref<12x8xf32, #tpu.memory_space<vmem>>, vector<12x8xf32>
    %cst = arith.constant dense<0.000000e+00> : vector<16x8xf32>
    %14 = tpu.matmul %12, %13, %cst {dimension_numbers = #tpu.dot_dimension_numbers<[1], [0], [0], [1], [0, 0, 1, 1], [], []>} : vector<16x12xf32>, vector<12x8xf32>, vector<16x8xf32> -> vector<16x8xf32>
    %c0_18 = arith.constant 0 : index
    %c0_19 = arith.constant 0 : index
    %15 = vector.load %arg4[%c0_18, %c0_19] : memref<1x8xf32, #tpu.memory_space<vmem>>, vector<1x8xf32>
    %16 = vector.broadcast %15 : vector<1x8xf32> to vector<16x8xf32>
    %17 = arith.addf %14, %16 : vector<16x8xf32>
    %18 = vector.extract_strided_slice %17 {offsets = [0, 0], sizes = [16, 4], strides = [1, 1]} : vector<16x8xf32> to vector<16x4xf32>
    %19 = vector.extract_strided_slice %17 {offsets = [0, 4], sizes = [16, 4], strides = [1, 1]} : vector<16x8xf32> to vector<16x4xf32>
    %20 = math.tanh %18 : vector<16x4xf32>
    %21 = arith.negf %19 : vector<16x4xf32>
    %22 = math.exp %21 : vector<16x4xf32>
    %cst_20 = arith.constant 1.000000e+00 : f32
    %23 = vector.broadcast %cst_20 : f32 to vector<16x4xf32>
    %24 = arith.addf %23, %22 : vector<16x4xf32>
    %25 = arith.divf %23, %24 : vector<16x4xf32>
    %26 = arith.mulf %20, %25 : vector<16x4xf32>
    %c0_21 = arith.constant 0 : index
    %c0_22 = arith.constant 0 : index
    %27 = vector.load %arg5[%c0_21, %c0_22] : memref<4x4xf32, #tpu.memory_space<vmem>>, vector<4x4xf32>
    %cst_23 = arith.constant dense<0.000000e+00> : vector<16x4xf32>
    %28 = tpu.matmul %26, %27, %cst_23 {dimension_numbers = #tpu.dot_dimension_numbers<[1], [0], [0], [1], [0, 0, 1, 1], [], []>} : vector<16x4xf32>, vector<4x4xf32>, vector<16x4xf32> -> vector<16x4xf32>
    %c0_24 = arith.constant 0 : index
    %c0_25 = arith.constant 0 : index
    %29 = vector.load %arg6[%c0_24, %c0_25] : memref<1x4xf32, #tpu.memory_space<vmem>>, vector<1x4xf32>
    %30 = vector.broadcast %29 : vector<1x4xf32> to vector<16x4xf32>
    %31 = arith.addf %28, %30 : vector<16x4xf32>
    %c0_26 = arith.constant 0 : index
    %c0_27 = arith.constant 0 : index
    %c0_28 = arith.constant 0 : index
    %32 = vector.load %arg8[%c0_26, %c0_27, %c0_28] : memref<1x16x4xf32, #tpu.memory_space<vmem>>, vector<1x16x4xf32>
    %33 = vector.shape_cast %32 : vector<1x16x4xf32> to vector<16x4xf32>
    %34 = vector.shape_cast %31 : vector<16x4xf32> to vector<1x16x4xf32>
    tpu.vector_store %arg8[%c0_26, %c0_27, %c0_28], %34 {strides = array<i32>} : memref<1x16x4xf32, #tpu.memory_space<vmem>>, vector<1x16x4xf32>,
    %35 = arith.addf %4, %31 : vector<16x4xf32>
    %c0_29 = arith.constant 0 : index
    %c0_30 = arith.constant 0 : index
    %c0_31 = arith.constant 0 : index
    %36 = vector.load %arg7[%c0_29, %c0_30, %c0_31] : memref<1x16x4xf32, #tpu.memory_space<vmem>>, vector<1x16x4xf32>
    %37 = vector.shape_cast %36 : vector<1x16x4xf32> to vector<16x4xf32>
    %38 = vector.shape_cast %35 : vector<16x4xf32> to vector<1x16x4xf32>
    tpu.vector_store %arg7[%c0_29, %c0_30, %c0_31], %38 {strides = array<i32>} : memref<1x16x4xf32, #tpu.memory_space<vmem>>, vector<1x16x4xf32>,
    %c20 = arith.constant 20 : index
    %c0_32 = arith.constant 0 : index
    %39 = vector.load %arg9[%c20, %c0_32] : memref<24x4xf32, #tpu.memory_space<vmem>>, vector<4x4xf32>
    %c4_33 = arith.constant 4 : index
    %c0_34 = arith.constant 0 : index
    %40 = vector.load %arg9[%c4_33, %c0_34] : memref<24x4xf32, #tpu.memory_space<vmem>>, vector<4x4xf32>
    tpu.vector_store %arg9[%c4_33, %c0_34], %39 {strides = array<i32>} : memref<24x4xf32, #tpu.memory_space<vmem>>, vector<4x4xf32>,
    return
  }
  func.func @transform_0(%arg0: i32, %arg1: i32) -> (i32, i32, i32) {
    %c0_i32 = arith.constant 0 : i32
    %c0_i32_0 = arith.constant 0 : i32
    return %arg0, %arg1, %c0_i32 : i32, i32, i32
  }
  func.func @transform_1(%arg0: i32, %arg1: i32) -> (i32, i32) {
    %c0_i32 = arith.constant 0 : i32
    %c0_i32_0 = arith.constant 0 : i32
    %c0_i32_1 = arith.constant 0 : i32
    return %c0_i32, %c0_i32_0 : i32, i32
  }
  func.func @transform_2(%arg0: i32, %arg1: i32) -> (i32, i32) {
    %c0_i32 = arith.constant 0 : i32
    %c0_i32_0 = arith.constant 0 : i32
    %c0_i32_1 = arith.constant 0 : i32
    return %c0_i32, %c0_i32_0 : i32, i32
  }
  func.func @transform_3(%arg0: i32, %arg1: i32) -> (i32, i32) {
    %c0_i32 = arith.constant 0 : i32
    %c0_i32_0 = arith.constant 0 : i32
    %c0_i32_1 = arith.constant 0 : i32
    return %c0_i32, %c0_i32_0 : i32, i32
  }
  func.func @transform_4(%arg0: i32, %arg1: i32) -> (i32, i32) {
    %c0_i32 = arith.constant 0 : i32
    %c0_i32_0 = arith.constant 0 : i32
    %c0_i32_1 = arith.constant 0 : i32
    return %c0_i32, %c0_i32_0 : i32, i32
  }
  func.func @transform_5(%arg0: i32, %arg1: i32) -> (i32, i32, i32) {
    %c0_i32 = arith.constant 0 : i32
    %c0_i32_0 = arith.constant 0 : i32
    return %arg0, %arg1, %c0_i32 : i32, i32, i32
  }
  func.func @transform_6(%arg0: i32, %arg1: i32) -> (i32, i32, i32) {
    %c0_i32 = arith.constant 0 : i32
    %c0_i32_0 = arith.constant 0 : i32
    return %arg0, %arg1, %c0_i32 : i32, i32, i32
  }
}

</mosaic_0001>

<bundles_post_ra>
// kernel: tpu_custom_call.1
= control target key start
LH: loop header
LB: loop body
LE: loop exit
PB: predicated region body
PF: predicated region fallthrough
CT: control target
= control target key end

     0   :  { %s871_s21 = smov 0   ;;  %s873_s22 = smov 0   ;;  %s949_s0 = inlined_call_operand.vmem [shape: f32[2,16,4], index: 0, kind: input, shape index: {}]   ;;  %s950_s1 = inlined_call_operand.vmem [shape: f32[12,8], index: 1, kind: input, shape index: {}]   ;;  %s951_s2 = inlined_call_operand.vmem [shape: f32[1,8], index: 2, kind: input, shape index: {}]   ;;  %s952_s3 = inlined_call_operand.vmem [shape: f32[4,4], index: 3, kind: input, shape index: {}]   ;;  %s953_s4 = inlined_call_operand.vmem [shape: f32[1,4], index: 4, kind: input, shape index: {}]   ;;  %s954_s5 = inlined_call_operand.vmem [shape: f32[2,16,4], index: 5, kind: output, shape index: {0}]   ;;  %s955_s6 = inlined_call_operand.vmem [shape: f32[2,16,4], index: 6, kind: output, shape index: {1}]  }
   0x1   :  { %s875_s23 = smov 0  }
   0x2 LB: > { %s29_s24 = sadd.s32 1, %s825_s22  ;;  %p719_p0 = scmp.ge.s32.totalorder %s829_s23, 1  ;;  %s829_s23 = sphi %s875_s23, %s17_s23   ;;  %s825_s22 = sphi %s873_s22, %s957_s22   ;;  %s821_s21 = sphi %s871_s21, %s956_s21  }
   0x3   : > { %p31_p1 = scmp.ge.s32.totalorder %s29_s24, 2  ;;  %p238_p2 = scmp.lt.s32.totalorder %s829_s23, 3 }
   0x5   : > { %s959_s24 = smov (%p31_p1, %s29_s24), 0  ;;  %p239_p3 = pnand %p719_p0, %p238_p2 }
   0x6   : > { %p286_p4 = scmp.lt.s32.totalorder (!%p239_p3), %s821_s21, 1  ;;  %vm319_vm0 = vcmask (!%p239_p3), 31744   ;;  %v831_v0 = vmov (!%p239_p3), 0.0   ;;  %v358_v3 = vld [vmem:[%s950_s1] sm:$0xff] (!%p239_p3)  ;;  %v359_v4 = vld [vmem:[%s950_s1 + $0x8] sm:$0xf] (!%p239_p3) }
   0x7   : > { %242 = sbr.rel (%p239_p3) target bundleno = 731 (0x2db), region = 40  ;;  %320 = vst.msk [vmem:[#allocation2] sm:$0xff] (!%p239_p3), %vm319_vm0, %v831_v0  ;;  %vm374_vm1 = vcmask (!%p239_p3), 1043456   ;;  %v760_v5 = vpack.c.bf16 (!%p239_p3), %v359_v4, %v358_v3  ;;  %vm832_vm2 = vmmov (!%p239_p3), 1   ;;  %vm576_vm4 = vcmask (!%p239_p3), 27648   ;;  %s833_s9 = smov (!%p239_p3), 4  }
   0x8   : > { %vm761_vm3 = vmpackc.low (!%p239_p3), %vm374_vm1, %vm832_vm2  ;;  %s834_s10 = smov (!%p239_p3), 8   ;;  %vm340_vm5 = vcmask (!%p239_p3), 64544   ;;  %vm353_vm6 = vcmask (!%p239_p3), 97344   ;;  %vm367_vm7 = vcmask (!%p239_p3), 97280   ;;  %v726_v19 = vld [vmem:[%s951_s2] ss:$0 sm:$0xff] (!%p239_p3) }
   0x9   : > { %762 = vmatprep.subr.msk.bf16.mxu0 (!%p239_p3), %vm761_vm3, %v760_v5  ;;  %v477_v30 = vld [vmem:[%s952_s3] sm:$0xf] (!%p239_p3)  ;;  %s835_s15 = smov (!%p239_p3), 124  }
   0xa   : > { %765 = vmatpush3.bf16.msk.msra.mxu0 (!%p239_p3), %vm761_vm3, %v760_v5  ;;  %755 = vmatprep.subr.msk.mxu1 (!%p239_p3), %vm374_vm1, %v477_v30  ;;  %v732_v39 = vld [vmem:[%s953_s4] ss:$0 sm:$0xff] (!%p239_p3) }
   0xb   : > { %756 = vmatpush3.msk.msra.mxu1 (!%p239_p3), %vm374_vm1, %v477_v30 }
   0xe   : > { %s961_s21 = smov (!%p286_p4, %s821_s21), 1 }
   0xf   : > { %s890_s25 = sshll.u32 %s961_s21, 4 }
  0x10   : > { %s293_s28 = scalar_lea.vmem %s949_s0, %s890_s25  ;;  %s313_s20 = scalar_lea.vmem %s955_s6, %s890_s25 }
  0x11   : > { %v896_v1 = vld [vmem:[%s293_s28] sm:$0xff]  ;;  %v898_v2 = vld [vmem:[%s293_s28 + $0x8] sm:$0xff]  ;;  %s303_s27 = scalar_lea.vmem %s954_s5, %s890_s25 }
  0x12   : > { %324 = vst.msk [vmem:[#allocation2 + $0x8] sm:$0xff] %vm319_vm0, %v896_v1  ;;  %325 = vst.msk [vmem:[#allocation2 + $0x10] sm:$0xff] %vm319_vm0, %v898_v2 }
  0x19   : > { %v330_v6 = vld [vmem:[#allocation2 + $0x6] sm:$0xff]  ;;  %v575_v8 = vld [vmem:[#allocation2 + $0x14] sm:$0xf] }
  0x1a   : > { %v343_v7 = vld [vmem:[#allocation2 + $0x8] sm:$0xff]  ;;  %334 = vrot.lane.b32.xlu0 %v330_v6, %s833_s9  ;;  %v344_v11 = vld [vmem:[#allocation2 + $0x10] sm:$0xff] }
  0x1b   : > { %347 = vrot.lane.b32.xlu1 %v343_v7, %s834_s10  ;;  %v326_v9 = vld [vmem:[#allocation2 + $0x4] sm:$0xff]  ;;  %v331_v10 = vld [vmem:[#allocation2 + $0xe] sm:$0xff] }
  0x1c   : > { %328 = vst.msk [vmem:[#allocation3] sm:$0xff] %vm319_vm0, %v326_v9  ;;  %v327_v12 = vld [vmem:[#allocation2 + $0xc] sm:$0xff] }
  0x1d   : > { %577 = vst.msk [vmem:[#allocation2 + $0x4] sm:$0xf] %vm576_vm4, %v575_v8 }
  0x1e   : > { %329 = vst.msk [vmem:[#allocation3 + $0x8] sm:$0xff] %vm319_vm0, %v327_v12  ;;  %336 = vrot.lane.b32.xlu0 %v331_v10, %s833_s9 }
  0x1f   : > { %349 = vrot.lane.b32.xlu1 %v344_v11, %s834_s10 }
  0x8c   : > { %v335_v13 = vpop.permute.xlu0 %334 }
  0x8d   : > { %v348_v14 = vpop.permute.xlu1 %347  ;;  %341 = vst.msk [vmem:[#allocation3] sm:$0xff] %vm340_vm5, %v335_v13 }
  0x8e   : > { %354 = vst.msk [vmem:[#allocation3] sm:$0xff] %vm353_vm6, %v348_v14 }
  0x90   : > { %v337_v15 = vpop.permute.xlu0 %336 }
  0x91   : > { %v350_v16 = vpop.permute.xlu1 %349  ;;  %342 = vst.msk [vmem:[#allocation3 + $0x8] sm:$0xff] %vm340_vm5, %v337_v15 }
  0x92   : > { %355 = vst.msk [vmem:[#allocation3 + $0x8] sm:$0xff] %vm353_vm6, %v350_v16 }
  0x95   : > { %v356_v17 = vld [vmem:[#allocation3] sm:$0xff] }
  0x96   : > { %752 = vmatprep.mubr.msk.f32.mxu0 %vm367_vm7, %v356_v17 }
  0x99   : > { %v357_v18 = vld [vmem:[#allocation3 + $0x8] sm:$0xff] }
  0x9a   : > { %753 = vmatmul.mubr.msk.f32.vlgmr.msra.gmra.mrb[0].mxu0 %vm367_vm7, %v357_v18 }
 0x16d   : > { %v754_v20 = vpop.f32.mrb[0].mxu0 }
 0x16e   : > { %v450_v21 = vadd.f32 %v754_v20, %v726_v19  ;;  %v444_v22 = vpop.f32.mrb[1].mxu0 }
 0x16f   : > { %v445_v23 = vadd.f32 %v726_v19, %v444_v22 }
 0x170   : > { %v731_v24 = vmul.f32 -1.442695, %v450_v21 }
 0x171   : > { %v730_v25 = vmul.f32 -1.442695, %v445_v23 }
 0x172   : > { %795 = vpow2.f32 %v731_v24 }
 0x173   : > { %797 = vpow2.f32 %v730_v25 }
 0x17c   : > { %v796_v26 = vpop.eup %795 }
 0x17d   : > { %v798_v27 = vpop.eup %797  ;;  %v462_v28 = vadd.f32 1.0, %v796_v26 }
 0x17e   : > { %v461_v29 = vadd.f32 1.0, %v798_v27 }
 0x17f   : > { %799 = vrcp.f32 %v462_v28 }
 0x180   : > { %801 = vrcp.f32 %v461_v29 }
 0x181   : > { %803 = vtanh.f32 %v445_v23 }
 0x182   : > { %805 = vtanh.f32 %v450_v21 }
 0x189   : > { %v800_v31 = vpop.eup %799 }
 0x18a   : > { %v802_v32 = vpop.eup %801  ;;  %471 = vrot.lane.b32.xlu1 %v800_v31, %s835_s15 }
 0x18b   : > { %469 = vrot.lane.b32.xlu0 %v802_v32, %s835_s15  ;;  %v804_v34 = vpop.eup %803 }
 0x18c   : > { %v806_v36 = vpop.eup %805 }
 0x1fc   : > { %v472_v33 = vpop.permute.xlu1 %471 }
 0x1fd   : > { %v470_v35 = vpop.permute.xlu0 %469  ;;  %v476_v38 = vmul.f32 %v806_v36, %v472_v33 }
 0x1fe   : > { %v475_v37 = vmul.f32 %v804_v34, %v470_v35 }
 0x200   : > { %757 = vmatprep.mubr.msk.f32.mxu1 %vm319_vm0, %v475_v37 }
 0x201   : > { %758 = vmatmul.mubr.msk.f32.vlgmr.msra.gmra.mrb[0].mxu1 %vm319_vm0, %v476_v38 }
 0x2d4   : > { %v759_v40 = vpop.f32.mrb[0].mxu1 }
 0x2d5   : > { %v566_v41 = vadd.f32 %v759_v40, %v732_v39  ;;  %v560_v42 = vpop.f32.mrb[1].mxu1 }
 0x2d6   : > { %v561_v43 = vadd.f32 %v732_v39, %v560_v42 }
 0x2d7   : > { %570 = vst.msk [vmem:[%s313_s20 + $0x8] sm:$0xff] %vm319_vm0, %v566_v41  ;;  %v572_v44 = vadd.f32 %v566_v41, %v898_v2 }
 0x2d8   : > { %569 = vst.msk [vmem:[%s313_s20] sm:$0xff] %vm319_vm0, %v561_v43  ;;  %v571_v45 = vadd.f32 %v561_v43, %v896_v1 }
 0x2d9   : > { %574 = vst.msk [vmem:[%s303_s27 + $0x8] sm:$0xff] %vm319_vm0, %v572_v44 }
 0x2da   : > { %573 = vst.msk [vmem:[%s303_s27] sm:$0xff] %vm319_vm0, %v571_v45 }
 0x2db PF: > { %s17_s23 = sadd.s32 1, %s829_s23   ;;  %s956_s21 = smov %s825_s22 }
 0x2dc   : > { %p14_p5 = scmp.ge.s32.totalorder %s17_s23, 4   ;;  %s957_s22 = smov %s959_s24 }
 0x2de   :  { %16 = sbr.rel (!%p14_p5) target bundleno = 2 (0x2), region = 86 }

</bundles_post_ra>
